<compile_context>
chip_gen: v7x
topology: tpu7x:2x2x1
jax: 0.10.0
libtpu: 0.0.40
codegen_flags: <defaults>
</compile_context>

<pallas_src>
import functools

import jax
import jax.numpy as jnp
from jax import lax
from jax.experimental import pallas as pl
from jax.experimental.pallas import tpu as pltpu


def _block_kernel(cur_ref, beta_ref, bv_ref, vth_ref, *out_refs,
                  t_len, emit_spikes):
    if emit_spikes:
        g_ref, z_ref, spk_ref, mem_ref = out_refs
    else:
        g_ref, z_ref, mem_ref = out_refs

    n_tile, T = cur_ref.shape
    cur = cur_ref[...]                      # (n_tile, T)
    beta = beta_ref[...]                    # (n_tile, 1)
    bv = bv_ref[...]                        # (n_tile, 1) = beta * v_init (or 0)
    vth = vth_ref[...]                      # (n_tile, T)

    lane = lax.broadcasted_iota(jnp.int32, (n_tile, T), 1)

    # fused v_init correction: current[:, 0] += beta * v_init
    cur = cur + jnp.where(lane == 0, bv, 0.0)

    steps = min(t_len, T)

    # membrane: banded causal conv as shift-and-accumulate; beta^d built by
    # iterative multiply (no jnp.power, no (T,T) kernel materialization).
    mem = cur                               # d = 0 term (beta^0 = 1)
    bpow = beta                             # beta^1
    for d in range(1, steps):
        sh = jnp.where(lane >= d, pltpu.roll(cur, shift=d, axis=1), 0.0)
        mem = mem + bpow * sh
        bpow = bpow * beta

    # forward spike is a Heaviside for all surrogate-gradient types
    spikes = (mem - vth > 0.0).astype(jnp.float32)

    # z: same banded shift-add with exact integer weights 1..t_len
    z = spikes                              # d = 0 weight is 1
    for d in range(1, steps):
        sh = jnp.where(lane >= d, pltpu.roll(spikes, shift=d, axis=1), 0.0)
        z = z + float(d + 1) * sh

    # Block.g: keep only entries exactly equal to 1.0 (z is integer-exact)
    g_ref[...] = jnp.where(z == 1.0, 1.0, 0.0)
    z_ref[...] = z
    mem_ref[...] = mem
    if emit_spikes:
        spk_ref[...] = spikes


def block_forward(current, beta, v_th, v_init=None, mode="train", t_len=None):
    """current: (B, n_in, T) f32; beta: (n_in,) f32; v_th: (B, n_in, T) f32;
    v_init: (B, n_in) f32 or None."""
    B, n_in, T = current.shape
    if t_len is None:
        t_len = T

    current = current.astype(jnp.float32)
    beta = beta.astype(jnp.float32)
    v_th = v_th.astype(jnp.float32)
    beta2 = beta.reshape(n_in, 1)

    # v_init folded into the kernel as a (B, n_in, 1) side input (no wrapper
    # .at[].add pass over `current`).
    if v_init is not None:
        bv = (beta[None, :] * v_init.astype(jnp.float32)).reshape(B, n_in, 1)
    else:
        bv = jnp.zeros((B, n_in, 1), jnp.float32)

    # n_in tiling: extra parallel grid axis for megacore / VMEM headroom.
    if n_in > 256 and n_in % 256 == 0:
        n_tile = 256
    else:
        n_tile = n_in
    n_blocks = n_in // n_tile

    emit_spikes = (mode == "val")
    n_out = 4 if emit_spikes else 3
    out_shapes = tuple(jax.ShapeDtypeStruct((B, n_in, T), jnp.float32)
                       for _ in range(n_out))

    def tile_spec():
        return pl.BlockSpec((None, n_tile, T), lambda b, c: (b, c, 0))

    in_specs = [
        tile_spec(),                                              # current
        pl.BlockSpec((n_tile, 1), lambda b, c: (c, 0)),           # beta
        pl.BlockSpec((None, n_tile, 1), lambda b, c: (b, c, 0)),  # beta*v_init
        tile_spec(),                                              # v_th
    ]
    out_specs = [tile_spec() for _ in range(n_out)]

    outs = pl.pallas_call(
        functools.partial(_block_kernel, t_len=t_len, emit_spikes=emit_spikes),
        out_shape=out_shapes,
        grid_spec=pltpu.PrefetchScalarGridSpec(
            num_scalar_prefetch=0,
            grid=(B, n_blocks),
            in_specs=in_specs,
            out_specs=out_specs,
        ),
        compiler_params=pltpu.CompilerParams(
            dimension_semantics=("parallel", "parallel")),
    )(current, beta2, bv, v_th)

    if mode == "train":
        g, z_copy, membrane = outs
        return g, z_copy, membrane
    elif mode == "val":
        g, z_copy, spikes, membrane = outs
        return g, z_copy, spikes, membrane
    raise ValueError(mode)


def _reference(current, beta, v_th, v_init, t_len):
    """Pure-JAX reference of the PyTorch Block.forward."""
    cur = current.astype(jnp.float32)
    if v_init is not None:
        cur = cur.at[:, :, 0].add(beta[None, :] * v_init)
    T = cur.shape[-1]
    t = jnp.arange(T)[:, None]
    j = jnp.arange(T)[None, :]
    window = (t - j >= 0) & (t - j < t_len)
    expo = jnp.maximum(t - j, 0).astype(jnp.float32)
    K = jnp.where(window[None], beta[:, None, None] ** expo[None], 0.0)
    mem = jnp.einsum("itj,bij->bit", K, cur)
    spk = (mem - v_th > 0.0).astype(jnp.float32)
    phi = jnp.where(window, (t - j + 1).astype(jnp.float32), 0.0)  # phi[t, j]
    z = jnp.einsum("bij,tj->bit", spk, phi)
    g = jnp.where(z == 1.0, 1.0, 0.0)
    return g, z, spk, mem


if __name__ == "__main__":
    key = jax.random.PRNGKey(0)

    # --- test 1: train mode, T == t_len, with v_init (matches module usage) ---
    B, n_in, t_len = 2, 32, 8
    k1, k2, k3, k4 = jax.random.split(key, 4)
    current = jax.random.normal(k1, (B, n_in, t_len), dtype=jnp.float32)
    beta = jax.random.uniform(k2, (n_in,), minval=0.5, maxval=0.95,
                              dtype=jnp.float32)
    v_th = 1.0 + 0.1 * jax.random.normal(k3, (B, n_in, t_len), dtype=jnp.float32)
    v_init = jax.random.normal(k4, (B, n_in), dtype=jnp.float32)

    g, z_copy, membrane = block_forward(current, beta, v_th, v_init=v_init,
                                        mode="train", t_len=t_len)
    jax.block_until_ready((g, z_copy, membrane))

    g_r, z_r, _, mem_r = _reference(current, beta, v_th, v_init, t_len)
    assert jnp.allclose(membrane, mem_r, atol=1e-4, rtol=1e-4), "membrane mismatch"
    assert jnp.allclose(z_copy, z_r, atol=1e-5), "z mismatch"
    assert jnp.array_equal(g, g_r), "g(z) mismatch"

    # --- test 2: val mode, T > t_len (exercises the banded window + spikes out) ---
    T2 = 16
    k5, k6, k7 = jax.random.split(k4, 3)
    current2 = jax.random.normal(k5, (B, n_in, T2), dtype=jnp.float32)
    v_th2 = 1.0 + 0.1 * jax.random.normal(k6, (B, n_in, T2), dtype=jnp.float32)

    g2, z2, spk2, mem2 = block_forward(current2, beta, v_th2, v_init=None,
                                       mode="val", t_len=t_len)
    jax.block_until_ready((g2, z2, spk2, mem2))

    g2_r, z2_r, spk2_r, mem2_r = _reference(current2, beta, v_th2, None, t_len)
    assert jnp.allclose(mem2, mem2_r, atol=1e-4, rtol=1e-4), "membrane mismatch (val)"
    assert jnp.allclose(z2, z2_r, atol=1e-5), "z mismatch (val)"
    assert jnp.array_equal(spk2, spk2_r), "spikes mismatch (val)"
    assert jnp.array_equal(g2, g2_r), "g(z) mismatch (val)"

    print("KERNEL_OK")
</pallas_src>

<mosaic_0001>
module attributes {stable_mosaic.version = 11 : i64} {
  func.func @_block_kernel(%arg0: i32, %arg1: i32, %arg2: memref<1x32x8xf32, #tpu.memory_space<vmem>>, %arg3: memref<32x1xf32, #tpu.memory_space<vmem>>, %arg4: memref<1x32x1xf32, #tpu.memory_space<vmem>>, %arg5: memref<1x32x8xf32, #tpu.memory_space<vmem>>, %arg6: memref<1x32x8xf32, #tpu.memory_space<vmem>>, %arg7: memref<1x32x8xf32, #tpu.memory_space<vmem>>, %arg8: memref<1x32x8xf32, #tpu.memory_space<vmem>>) attributes {dimension_semantics = [#tpu.dimension_semantics<parallel>, #tpu.dimension_semantics<parallel>], iteration_bounds = array<i64: 2, 1>, scalar_prefetch = 0 : i64, scratch_operands = 0 : i64, tpu.core_type = #tpu.core_type<tc>, window_params = [{transform_indices = @transform_0, window_bounds = array<i64: 1, 32, 8>}, {transform_indices = @transform_1, window_bounds = array<i64: 32, 1>}, {transform_indices = @transform_2, window_bounds = array<i64: 1, 32, 1>}, {transform_indices = @transform_3, window_bounds = array<i64: 1, 32, 8>}, {transform_indices = @transform_4, window_bounds = array<i64: 1, 32, 8>}, {transform_indices = @transform_5, window_bounds = array<i64: 1, 32, 8>}, {transform_indices = @transform_6, window_bounds = array<i64: 1, 32, 8>}]} {
    %c0 = arith.constant 0 : index
    %c0_0 = arith.constant 0 : index
    %c0_1 = arith.constant 0 : index
    %0 = vector.load %arg2[%c0, %c0_0, %c0_1] : memref<1x32x8xf32, #tpu.memory_space<vmem>>, vector<1x32x8xf32>
    %1 = vector.shape_cast %0 : vector<1x32x8xf32> to vector<32x8xf32>
    %c0_2 = arith.constant 0 : index
    %c0_3 = arith.constant 0 : index
    %2 = vector.load %arg3[%c0_2, %c0_3] : memref<32x1xf32, #tpu.memory_space<vmem>>, vector<32x1xf32>
    %c0_4 = arith.constant 0 : index
    %c0_5 = arith.constant 0 : index
    %c0_6 = arith.constant 0 : index
    %3 = vector.load %arg4[%c0_4, %c0_5, %c0_6] : memref<1x32x1xf32, #tpu.memory_space<vmem>>, vector<1x32x1xf32>
    %4 = vector.shape_cast %3 : vector<1x32x1xf32> to vector<32x1xf32>
    %c0_7 = arith.constant 0 : index
    %c0_8 = arith.constant 0 : index
    %c0_9 = arith.constant 0 : index
    %5 = vector.load %arg5[%c0_7, %c0_8, %c0_9] : memref<1x32x8xf32, #tpu.memory_space<vmem>>, vector<1x32x8xf32>
    %6 = vector.shape_cast %5 : vector<1x32x8xf32> to vector<32x8xf32>
    %7 = tpu.iota {dimensions = array<i32: 1>} : vector<32x8xi32>
    %c0_i32 = arith.constant 0 : i32
    %8 = vector.broadcast %c0_i32 : i32 to vector<32x8xi32>
    %9 = arith.cmpi eq, %7, %8 : vector<32x8xi32>
    %cst = arith.constant 0.000000e+00 : f32
    %10 = vector.shape_cast %4 : vector<32x1xf32> to vector<32x1xf32>
    %11 = vector.broadcast %10 : vector<32x1xf32> to vector<32x8xf32>
    %12 = vector.broadcast %cst : f32 to vector<32x8xf32>
    %13 = arith.select %9, %11, %12 : vector<32x8xi1>, vector<32x8xf32>
    %14 = arith.addf %1, %13 : vector<32x8xf32>
    %c1_i32 = arith.constant 1 : i32
    %15 = vector.broadcast %c1_i32 : i32 to vector<32x8xi32>
    %16 = arith.cmpi sge, %7, %15 : vector<32x8xi32>
    %c1_i32_10 = arith.constant 1 : i32
    %17 = tpu.dynamic_rotate %14 by %c1_i32_10 dim 1 : vector<32x8xf32>, i32 -> vector<32x8xf32>
    %cst_11 = arith.constant 0.000000e+00 : f32
    %18 = vector.broadcast %cst_11 : f32 to vector<32x8xf32>
    %19 = arith.select %16, %17, %18 : vector<32x8xi1>, vector<32x8xf32>
    %20 = vector.broadcast %2 : vector<32x1xf32> to vector<32x8xf32>
    %21 = arith.mulf %20, %19 : vector<32x8xf32>
    %22 = arith.addf %14, %21 : vector<32x8xf32>
    %23 = arith.mulf %2, %2 : vector<32x1xf32>
    %c2_i32 = arith.constant 2 : i32
    %24 = vector.broadcast %c2_i32 : i32 to vector<32x8xi32>
    %25 = arith.cmpi sge, %7, %24 : vector<32x8xi32>
    %c2_i32_12 = arith.constant 2 : i32
    %26 = tpu.dynamic_rotate %14 by %c2_i32_12 dim 1 : vector<32x8xf32>, i32 -> vector<32x8xf32>
    %cst_13 = arith.constant 0.000000e+00 : f32
    %27 = vector.broadcast %cst_13 : f32 to vector<32x8xf32>
    %28 = arith.select %25, %26, %27 : vector<32x8xi1>, vector<32x8xf32>
    %29 = vector.broadcast %23 : vector<32x1xf32> to vector<32x8xf32>
    %30 = arith.mulf %29, %28 : vector<32x8xf32>
    %31 = arith.addf %22, %30 : vector<32x8xf32>
    %32 = arith.mulf %23, %2 : vector<32x1xf32>
    %c3_i32 = arith.constant 3 : i32
    %33 = vector.broadcast %c3_i32 : i32 to vector<32x8xi32>
    %34 = arith.cmpi sge, %7, %33 : vector<32x8xi32>
    %c3_i32_14 = arith.constant 3 : i32
    %35 = tpu.dynamic_rotate %14 by %c3_i32_14 dim 1 : vector<32x8xf32>, i32 -> vector<32x8xf32>
    %cst_15 = arith.constant 0.000000e+00 : f32
    %36 = vector.broadcast %cst_15 : f32 to vector<32x8xf32>
    %37 = arith.select %34, %35, %36 : vector<32x8xi1>, vector<32x8xf32>
    %38 = vector.broadcast %32 : vector<32x1xf32> to vector<32x8xf32>
    %39 = arith.mulf %38, %37 : vector<32x8xf32>
    %40 = arith.addf %31, %39 : vector<32x8xf32>
    %41 = arith.mulf %32, %2 : vector<32x1xf32>
    %c4_i32 = arith.constant 4 : i32
    %42 = vector.broadcast %c4_i32 : i32 to vector<32x8xi32>
    %43 = arith.cmpi sge, %7, %42 : vector<32x8xi32>
    %c4_i32_16 = arith.constant 4 : i32
    %44 = tpu.dynamic_rotate %14 by %c4_i32_16 dim 1 : vector<32x8xf32>, i32 -> vector<32x8xf32>
    %cst_17 = arith.constant 0.000000e+00 : f32
    %45 = vector.broadcast %cst_17 : f32 to vector<32x8xf32>
    %46 = arith.select %43, %44, %45 : vector<32x8xi1>, vector<32x8xf32>
    %47 = vector.broadcast %41 : vector<32x1xf32> to vector<32x8xf32>
    %48 = arith.mulf %47, %46 : vector<32x8xf32>
    %49 = arith.addf %40, %48 : vector<32x8xf32>
    %50 = arith.mulf %41, %2 : vector<32x1xf32>
    %c5_i32 = arith.constant 5 : i32
    %51 = vector.broadcast %c5_i32 : i32 to vector<32x8xi32>
    %52 = arith.cmpi sge, %7, %51 : vector<32x8xi32>
    %c5_i32_18 = arith.constant 5 : i32
    %53 = tpu.dynamic_rotate %14 by %c5_i32_18 dim 1 : vector<32x8xf32>, i32 -> vector<32x8xf32>
    %cst_19 = arith.constant 0.000000e+00 : f32
    %54 = vector.broadcast %cst_19 : f32 to vector<32x8xf32>
    %55 = arith.select %52, %53, %54 : vector<32x8xi1>, vector<32x8xf32>
    %56 = vector.broadcast %50 : vector<32x1xf32> to vector<32x8xf32>
    %57 = arith.mulf %56, %55 : vector<32x8xf32>
    %58 = arith.addf %49, %57 : vector<32x8xf32>
    %59 = arith.mulf %50, %2 : vector<32x1xf32>
    %c6_i32 = arith.constant 6 : i32
    %60 = vector.broadcast %c6_i32 : i32 to vector<32x8xi32>
    %61 = arith.cmpi sge, %7, %60 : vector<32x8xi32>
    %c6_i32_20 = arith.constant 6 : i32
    %62 = tpu.dynamic_rotate %14 by %c6_i32_20 dim 1 : vector<32x8xf32>, i32 -> vector<32x8xf32>
    %cst_21 = arith.constant 0.000000e+00 : f32
    %63 = vector.broadcast %cst_21 : f32 to vector<32x8xf32>
    %64 = arith.select %61, %62, %63 : vector<32x8xi1>, vector<32x8xf32>
    %65 = vector.broadcast %59 : vector<32x1xf32> to vector<32x8xf32>
    %66 = arith.mulf %65, %64 : vector<32x8xf32>
    %67 = arith.addf %58, %66 : vector<32x8xf32>
    %68 = arith.mulf %59, %2 : vector<32x1xf32>
    %c7_i32 = arith.constant 7 : i32
    %69 = vector.broadcast %c7_i32 : i32 to vector<32x8xi32>
    %70 = arith.cmpi sge, %7, %69 : vector<32x8xi32>
    %c7_i32_22 = arith.constant 7 : i32
    %71 = tpu.dynamic_rotate %14 by %c7_i32_22 dim 1 : vector<32x8xf32>, i32 -> vector<32x8xf32>
    %cst_23 = arith.constant 0.000000e+00 : f32
    %72 = vector.broadcast %cst_23 : f32 to vector<32x8xf32>
    %73 = arith.select %70, %71, %72 : vector<32x8xi1>, vector<32x8xf32>
    %74 = vector.broadcast %68 : vector<32x1xf32> to vector<32x8xf32>
    %75 = arith.mulf %74, %73 : vector<32x8xf32>
    %76 = arith.addf %67, %75 : vector<32x8xf32>
    %77 = arith.subf %76, %6 : vector<32x8xf32>
    %cst_24 = arith.constant 0.000000e+00 : f32
    %78 = vector.broadcast %cst_24 : f32 to vector<32x8xf32>
    %79 = arith.cmpf ogt, %77, %78 : vector<32x8xf32>
    %80 = arith.extui %79 : vector<32x8xi1> to vector<32x8xi32>
    %81 = arith.sitofp %80 : vector<32x8xi32> to vector<32x8xf32>
    %c1_i32_25 = arith.constant 1 : i32
    %82 = vector.broadcast %c1_i32_25 : i32 to vector<32x8xi32>
    %83 = arith.cmpi sge, %7, %82 : vector<32x8xi32>
    %c1_i32_26 = arith.constant 1 : i32
    %84 = tpu.dynamic_rotate %81 by %c1_i32_26 dim 1 : vector<32x8xf32>, i32 -> vector<32x8xf32>
    %cst_27 = arith.constant 0.000000e+00 : f32
    %85 = vector.broadcast %cst_27 : f32 to vector<32x8xf32>
    %86 = arith.select %83, %84, %85 : vector<32x8xi1>, vector<32x8xf32>
    %cst_28 = arith.constant 2.000000e+00 : f32
    %87 = vector.broadcast %cst_28 : f32 to vector<32x8xf32>
    %88 = arith.mulf %87, %86 : vector<32x8xf32>
    %89 = arith.addf %81, %88 : vector<32x8xf32>
    %c2_i32_29 = arith.constant 2 : i32
    %90 = vector.broadcast %c2_i32_29 : i32 to vector<32x8xi32>
    %91 = arith.cmpi sge, %7, %90 : vector<32x8xi32>
    %c2_i32_30 = arith.constant 2 : i32
    %92 = tpu.dynamic_rotate %81 by %c2_i32_30 dim 1 : vector<32x8xf32>, i32 -> vector<32x8xf32>
    %cst_31 = arith.constant 0.000000e+00 : f32
    %93 = vector.broadcast %cst_31 : f32 to vector<32x8xf32>
    %94 = arith.select %91, %92, %93 : vector<32x8xi1>, vector<32x8xf32>
    %cst_32 = arith.constant 3.000000e+00 : f32
    %95 = vector.broadcast %cst_32 : f32 to vector<32x8xf32>
    %96 = arith.mulf %95, %94 : vector<32x8xf32>
    %97 = arith.addf %89, %96 : vector<32x8xf32>
    %c3_i32_33 = arith.constant 3 : i32
    %98 = vector.broadcast %c3_i32_33 : i32 to vector<32x8xi32>
    %99 = arith.cmpi sge, %7, %98 : vector<32x8xi32>
    %c3_i32_34 = arith.constant 3 : i32
    %100 = tpu.dynamic_rotate %81 by %c3_i32_34 dim 1 : vector<32x8xf32>, i32 -> vector<32x8xf32>
    %cst_35 = arith.constant 0.000000e+00 : f32
    %101 = vector.broadcast %cst_35 : f32 to vector<32x8xf32>
    %102 = arith.select %99, %100, %101 : vector<32x8xi1>, vector<32x8xf32>
    %cst_36 = arith.constant 4.000000e+00 : f32
    %103 = vector.broadcast %cst_36 : f32 to vector<32x8xf32>
    %104 = arith.mulf %103, %102 : vector<32x8xf32>
    %105 = arith.addf %97, %104 : vector<32x8xf32>
    %c4_i32_37 = arith.constant 4 : i32
    %106 = vector.broadcast %c4_i32_37 : i32 to vector<32x8xi32>
    %107 = arith.cmpi sge, %7, %106 : vector<32x8xi32>
    %c4_i32_38 = arith.constant 4 : i32
    %108 = tpu.dynamic_rotate %81 by %c4_i32_38 dim 1 : vector<32x8xf32>, i32 -> vector<32x8xf32>
    %cst_39 = arith.constant 0.000000e+00 : f32
    %109 = vector.broadcast %cst_39 : f32 to vector<32x8xf32>
    %110 = arith.select %107, %108, %109 : vector<32x8xi1>, vector<32x8xf32>
    %cst_40 = arith.constant 5.000000e+00 : f32
    %111 = vector.broadcast %cst_40 : f32 to vector<32x8xf32>
    %112 = arith.mulf %111, %110 : vector<32x8xf32>
    %113 = arith.addf %105, %112 : vector<32x8xf32>
    %c5_i32_41 = arith.constant 5 : i32
    %114 = vector.broadcast %c5_i32_41 : i32 to vector<32x8xi32>
    %115 = arith.cmpi sge, %7, %114 : vector<32x8xi32>
    %c5_i32_42 = arith.constant 5 : i32
    %116 = tpu.dynamic_rotate %81 by %c5_i32_42 dim 1 : vector<32x8xf32>, i32 -> vector<32x8xf32>
    %cst_43 = arith.constant 0.000000e+00 : f32
    %117 = vector.broadcast %cst_43 : f32 to vector<32x8xf32>
    %118 = arith.select %115, %116, %117 : vector<32x8xi1>, vector<32x8xf32>
    %cst_44 = arith.constant 6.000000e+00 : f32
    %119 = vector.broadcast %cst_44 : f32 to vector<32x8xf32>
    %120 = arith.mulf %119, %118 : vector<32x8xf32>
    %121 = arith.addf %113, %120 : vector<32x8xf32>
    %c6_i32_45 = arith.constant 6 : i32
    %122 = vector.broadcast %c6_i32_45 : i32 to vector<32x8xi32>
    %123 = arith.cmpi sge, %7, %122 : vector<32x8xi32>
    %c6_i32_46 = arith.constant 6 : i32
    %124 = tpu.dynamic_rotate %81 by %c6_i32_46 dim 1 : vector<32x8xf32>, i32 -> vector<32x8xf32>
    %cst_47 = arith.constant 0.000000e+00 : f32
    %125 = vector.broadcast %cst_47 : f32 to vector<32x8xf32>
    %126 = arith.select %123, %124, %125 : vector<32x8xi1>, vector<32x8xf32>
    %cst_48 = arith.constant 7.000000e+00 : f32
    %127 = vector.broadcast %cst_48 : f32 to vector<32x8xf32>
    %128 = arith.mulf %127, %126 : vector<32x8xf32>
    %129 = arith.addf %121, %128 : vector<32x8xf32>
    %c7_i32_49 = arith.constant 7 : i32
    %130 = vector.broadcast %c7_i32_49 : i32 to vector<32x8xi32>
    %131 = arith.cmpi sge, %7, %130 : vector<32x8xi32>
    %c7_i32_50 = arith.constant 7 : i32
    %132 = tpu.dynamic_rotate %81 by %c7_i32_50 dim 1 : vector<32x8xf32>, i32 -> vector<32x8xf32>
    %cst_51 = arith.constant 0.000000e+00 : f32
    %133 = vector.broadcast %cst_51 : f32 to vector<32x8xf32>
    %134 = arith.select %131, %132, %133 : vector<32x8xi1>, vector<32x8xf32>
    %cst_52 = arith.constant 8.000000e+00 : f32
    %135 = vector.broadcast %cst_52 : f32 to vector<32x8xf32>
    %136 = arith.mulf %135, %134 : vector<32x8xf32>
    %137 = arith.addf %129, %136 : vector<32x8xf32>
    %cst_53 = arith.constant 1.000000e+00 : f32
    %138 = vector.broadcast %cst_53 : f32 to vector<32x8xf32>
    %139 = arith.cmpf oeq, %137, %138 : vector<32x8xf32>
    %cst_54 = arith.constant 1.000000e+00 : f32
    %cst_55 = arith.constant 0.000000e+00 : f32
    %140 = vector.broadcast %cst_54 : f32 to vector<32x8xf32>
    %141 = vector.broadcast %cst_55 : f32 to vector<32x8xf32>
    %142 = arith.select %139, %140, %141 : vector<32x8xi1>, vector<32x8xf32>
    %c0_56 = arith.constant 0 : index
    %c0_57 = arith.constant 0 : index
    %c0_58 = arith.constant 0 : index
    %143 = vector.load %arg6[%c0_56, %c0_57, %c0_58] : memref<1x32x8xf32, #tpu.memory_space<vmem>>, vector<1x32x8xf32>
    %144 = vector.shape_cast %143 : vector<1x32x8xf32> to vector<32x8xf32>
    %145 = vector.shape_cast %142 : vector<32x8xf32> to vector<1x32x8xf32>
    tpu.vector_store %arg6[%c0_56, %c0_57, %c0_58], %145 {strides = array<i32>} : memref<1x32x8xf32, #tpu.memory_space<vmem>>, vector<1x32x8xf32>,
    %c0_59 = arith.constant 0 : index
    %c0_60 = arith.constant 0 : index
    %c0_61 = arith.constant 0 : index
    %146 = vector.load %arg7[%c0_59, %c0_60, %c0_61] : memref<1x32x8xf32, #tpu.memory_space<vmem>>, vector<1x32x8xf32>
    %147 = vector.shape_cast %146 : vector<1x32x8xf32> to vector<32x8xf32>
    %148 = vector.shape_cast %137 : vector<32x8xf32> to vector<1x32x8xf32>
    tpu.vector_store %arg7[%c0_59, %c0_60, %c0_61], %148 {strides = array<i32>} : memref<1x32x8xf32, #tpu.memory_space<vmem>>, vector<1x32x8xf32>,
    %c0_62 = arith.constant 0 : index
    %c0_63 = arith.constant 0 : index
    %c0_64 = arith.constant 0 : index
    %149 = vector.load %arg8[%c0_62, %c0_63, %c0_64] : memref<1x32x8xf32, #tpu.memory_space<vmem>>, vector<1x32x8xf32>
    %150 = vector.shape_cast %149 : vector<1x32x8xf32> to vector<32x8xf32>
    %151 = vector.shape_cast %76 : vector<32x8xf32> to vector<1x32x8xf32>
    tpu.vector_store %arg8[%c0_62, %c0_63, %c0_64], %151 {strides = array<i32>} : memref<1x32x8xf32, #tpu.memory_space<vmem>>, vector<1x32x8xf32>,
    return
  }
  func.func @transform_0(%arg0: i32, %arg1: i32) -> (i32, i32, i32) {
    %c0_i32 = arith.constant 0 : i32
    %c0_i32_0 = arith.constant 0 : i32
    return %arg0, %arg1, %c0_i32 : i32, i32, i32
  }
  func.func @transform_1(%arg0: i32, %arg1: i32) -> (i32, i32) {
    %c0_i32 = arith.constant 0 : i32
    %c0_i32_0 = arith.constant 0 : i32
    return %arg1, %c0_i32 : i32, i32
  }
  func.func @transform_2(%arg0: i32, %arg1: i32) -> (i32, i32, i32) {
    %c0_i32 = arith.constant 0 : i32
    %c0_i32_0 = arith.constant 0 : i32
    return %arg0, %arg1, %c0_i32 : i32, i32, i32
  }
  func.func @transform_3(%arg0: i32, %arg1: i32) -> (i32, i32, i32) {
    %c0_i32 = arith.constant 0 : i32
    %c0_i32_0 = arith.constant 0 : i32
    return %arg0, %arg1, %c0_i32 : i32, i32, i32
  }
  func.func @transform_4(%arg0: i32, %arg1: i32) -> (i32, i32, i32) {
    %c0_i32 = arith.constant 0 : i32
    %c0_i32_0 = arith.constant 0 : i32
    return %arg0, %arg1, %c0_i32 : i32, i32, i32
  }
  func.func @transform_5(%arg0: i32, %arg1: i32) -> (i32, i32, i32) {
    %c0_i32 = arith.constant 0 : i32
    %c0_i32_0 = arith.constant 0 : i32
    return %arg0, %arg1, %c0_i32 : i32, i32, i32
  }
  func.func @transform_6(%arg0: i32, %arg1: i32) -> (i32, i32, i32) {
    %c0_i32 = arith.constant 0 : i32
    %c0_i32_0 = arith.constant 0 : i32
    return %arg0, %arg1, %c0_i32 : i32, i32, i32
  }
}

</mosaic_0001>

<bundles_post_ra>
// kernel: tpu_custom_call.1
= control target key start
LH: loop header
LB: loop body
LE: loop exit
PB: predicated region body
PF: predicated region fallthrough
CT: control target
= control target key end

     0   :  { %s1543_s21 = smov 0   ;;  %s1545_s22 = smov 0   ;;  %s1982_s0 = inlined_call_operand.vmem [shape: f32[2,32,8], index: 0, kind: input, shape index: {}]   ;;  %s1983_s1 = inlined_call_operand.vmem [shape: f32[32,1], index: 1, kind: input, shape index: {}]   ;;  %s1984_s2 = inlined_call_operand.vmem [shape: f32[2,32,1], index: 2, kind: input, shape index: {}]   ;;  %s1985_s3 = inlined_call_operand.vmem [shape: f32[2,32,8], index: 3, kind: input, shape index: {}]   ;;  %s1986_s4 = inlined_call_operand.vmem [shape: f32[2,32,8], index: 4, kind: output, shape index: {0}]   ;;  %s1987_s5 = inlined_call_operand.vmem [shape: f32[2,32,8], index: 5, kind: output, shape index: {1}]   ;;  %s1988_s6 = inlined_call_operand.vmem [shape: f32[2,32,8], index: 6, kind: output, shape index: {2}]  }
   0x1   :  { %s1547_s23 = smov 0  }
   0x2 LB: > { %s29_s24 = sadd.s32 1, %s1492_s22  ;;  %p1323_p0 = scmp.ge.s32.totalorder %s1496_s23, 1  ;;  %s1496_s23 = sphi %s1547_s23, %s17_s23   ;;  %s1492_s22 = sphi %s1545_s22, %s1990_s22   ;;  %s1488_s21 = sphi %s1543_s21, %s1989_s21  }
   0x3   : > { %p31_p1 = scmp.ge.s32.totalorder %s29_s24, 2  ;;  %p287_p2 = scmp.lt.s32.totalorder %s1496_s23, 3 }
   0x5   : > { %s1992_s24 = smov (%p31_p1, %s29_s24), 0  ;;  %p288_p3 = pnand %p1323_p0, %p287_p2 }
   0x6   : > { %p367_p4 = scmp.lt.s32.totalorder (!%p288_p3), %s1488_s21, 1  ;;  %v1498_v0 = vmov (!%p288_p3), 0   ;;  %v448_v5 = vlaneseq (!%p288_p3)  ;;  %s1499_s8 = smov (!%p288_p3), 8   ;;  %v436_v22 = vld [vmem:[%s1983_s1] sm:$0xff] (!%p288_p3)  ;;  %v1604_v24 = vld [vmem:[%s1983_s1 + $0x8] sm:$0xff] (!%p288_p3)  ;;  %v438_v25 = vld [vmem:[%s1983_s1 + $0x10] sm:$0xff] (!%p288_p3) }
   0x7   : > { %291 = sbr.rel (%p288_p3) target bundleno = 952 (0x3b8), region = 36  ;;  %1383 = vset.pattern.permute.xlu1 (!%p288_p3), %v1498_v0  ;;  %1382 = vset.pattern.permute.xlu0 (!%p288_p3), %v1498_v0  ;;  %v553_v26 = vmul.f32 (!%p288_p3), %v436_v22, %v436_v22  ;;  %v439_v27 = vld [vmem:[%s1983_s1 + $0x18] sm:$0xff] (!%p288_p3)  ;;  %v554_v28 = vmul.f32 (!%p288_p3), %v1604_v24, %v1604_v24  ;;  %v555_v29 = vmul.f32 (!%p288_p3), %v438_v25, %v438_v25  ;;  %vm480_vm1 = vcmask (!%p288_p3), 1047616   ;;  %s1500_s17 = smov (!%p288_p3), 121  }
   0x8   : > { %v1567_v6 = vand.u32 (!%p288_p3), 127, %v448_v5  ;;  %v556_v30 = vmul.f32 (!%p288_p3), %v439_v27, %v439_v27  ;;  %s1501_s18 = smov (!%p288_p3), 122   ;;  %s1502_s19 = smov (!%p288_p3), 123   ;;  %vm1067_vm9 = vcmask (!%p288_p3), 64512  }
   0x9   : > { %v602_v31 = vmul.f32 (!%p288_p3), %v553_v26, %v436_v22  ;;  %v603_v32 = vmul.f32 (!%p288_p3), %v554_v28, %v1604_v24  ;;  %v604_v33 = vmul.f32 (!%p288_p3), %v555_v29, %v438_v25  ;;  %s1503_s20 = smov (!%p288_p3), 124   ;;  %s1505_s26 = smov (!%p288_p3), 126  }
   0xa   : > { %vm450_vm0 = vcmp.eq.s32.totalorder (!%p288_p3), %v1567_v6, 0  ;;  %v605_v34 = vmul.f32 (!%p288_p3), %v556_v30, %v439_v27  ;;  %s1506_s27 = smov (!%p288_p3), 127   ;;  %vm479_vm2 = vcmp.ge.s32.totalorder (!%p288_p3), %v1567_v6, 1  ;;  %vm557_vm3 = vcmp.ge.s32.totalorder (!%p288_p3), %v1567_v6, 2 }
   0xb   : > { %v651_v35 = vmul.f32 (!%p288_p3), %v602_v31, %v436_v22  ;;  %v652_v36 = vmul.f32 (!%p288_p3), %v603_v32, %v1604_v24  ;;  %v653_v37 = vmul.f32 (!%p288_p3), %v604_v33, %v438_v25  ;;  %vm606_vm4 = vcmp.ge.s32.totalorder (!%p288_p3), %v1567_v6, 3 }
   0xc   : > { %v654_v38 = vmul.f32 (!%p288_p3), %v605_v34, %v439_v27  ;;  %vm655_vm5 = vcmp.ge.s32.totalorder (!%p288_p3), %v1567_v6, 4  ;;  %vm704_vm6 = vcmp.ge.s32.totalorder (!%p288_p3), %v1567_v6, 5  ;;  %vm753_vm7 = vcmp.ge.s32.totalorder (!%p288_p3), %v1567_v6, 6 }
   0xd   : > { %v700_v39 = vmul.f32 (!%p288_p3), %v651_v35, %v436_v22  ;;  %v701_v40 = vmul.f32 (!%p288_p3), %v652_v36, %v1604_v24  ;;  %v702_v41 = vmul.f32 (!%p288_p3), %v653_v37, %v438_v25  ;;  %vm802_vm8 = vcmp.ge.s32.totalorder (!%p288_p3), %v1567_v6, 7 }
   0xe   : > { %s1994_s21 = smov (!%p367_p4, %s1488_s21), 1  ;;  %v703_v42 = vmul.f32 %v654_v38, %v439_v27 }
   0xf   : > { %s1561_s25 = sshll.u32 %s1994_s21, 5  ;;  %v749_v43 = vmul.f32 %v700_v39, %v436_v22  ;;  %v751_v50 = vmul.f32 %v702_v41, %v438_v25  ;;  %v750_v53 = vmul.f32 %v701_v40, %v1604_v24  ;;  %s1504_s21 = smov 125  }
  0x10   : > { %s390_s28 = scalar_lea.vmem %s1984_s2, %s1561_s25  ;;  %s374_s7 = scalar_lea.vmem %s1982_s0, %s1561_s25  ;;  %v752_v55 = vmul.f32 %v703_v42, %v439_v27 }
  0x11   : > { %v442_v1 = vld [vmem:[%s390_s28 + $0x10] sm:$0xff]  ;;  %v440_v2 = vld [vmem:[%s390_s28] sm:$0xff]  ;;  %v443_v3 = vld [vmem:[%s390_s28 + $0x18] sm:$0xff]  ;;  %v798_v54 = vmul.f32 %v749_v43, %v436_v22  ;;  %v800_v56 = vmul.f32 %v751_v50, %v438_v25  ;;  %v799_v57 = vmul.f32 %v750_v53, %v1604_v24  ;;  %s1805_s30 = scalar_lea.vmem %s1985_s3, %s1561_s25  ;;  %s1819_s10 = scalar_lea.vmem %s1988_s6, %s1561_s25 }
  0x12   : > { %463 = vperm.xlu1 %1383, %v442_v1   ;;  %453 = vperm.xlu0 %1382, %v440_v2   ;;  %v441_v4 = vld [vmem:[%s390_s28 + $0x8] sm:$0xff]  ;;  %v432_v7 = vld [vmem:[%s374_s7] sm:$0xff]  ;;  %v434_v10 = vld [vmem:[%s374_s7 + $0x10] sm:$0xff]  ;;  %v801_v58 = vmul.f32 %v752_v55, %v439_v27  ;;  %s420_s12 = scalar_lea.vmem %s1987_s5, %s1561_s25  ;;  %s410_s15 = scalar_lea.vmem %s1986_s4, %s1561_s25 }
  0x13   : > { %v433_v14 = vld [vmem:[%s374_s7 + $0x8] sm:$0xff]  ;;  %v435_v20 = vld [vmem:[%s374_s7 + $0x18] sm:$0xff] }
  0x16   : > { %468 = vperm.xlu1 %1383, %v443_v3   ;;  %458 = vperm.xlu0 %1382, %v441_v4  }
  0x91   : > { %v464_v8 = vpop.permute.xlu1 %463  ;;  %v454_v9 = vpop.permute.xlu0 %453 }
  0x92   : > { %v473_v11 = vsel %vm450_vm0, %v464_v8, 0.0  ;;  %v471_v12 = vsel %vm450_vm0, %v454_v9, 0.0 }
  0x93   : > { %v1578_v13 = vadd.f32 %v471_v12, %v432_v7  ;;  %v1580_v15 = vadd.f32 %v473_v11, %v434_v10 }
  0x95   : > { %v469_v16 = vpop.permute.xlu1 %468  ;;  %v459_v17 = vpop.permute.xlu0 %458  ;;  %481 = vrot.lane.b32.xlu0 %v1578_v13, %s1499_s8 }
  0x96   : > { %v472_v18 = vsel %vm450_vm0, %v459_v17, 0.0  ;;  %v474_v21 = vsel %vm450_vm0, %v469_v16, 0.0 }
  0x97   : > { %v1586_v19 = vadd.f32 %v472_v18, %v433_v14  ;;  %v1597_v23 = vadd.f32 %v474_v21, %v435_v20 }
  0x99   : > { %484 = vrot.lane.b32.xlu1 %v1586_v19, %s1499_s8  ;;  %487 = vrot.lane.b32.xlu0 %v1580_v15, %s1499_s8 }
  0x9d   : > { %490 = vrot.lane.b32.xlu1 %v1597_v23, %s1499_s8  ;;  %527 = vperm.xlu0 %1382, %v436_v22  }
  0xa1   : > { %532 = vperm.xlu1 %1383, %v1604_v24   ;;  %537 = vperm.xlu0 %1382, %v438_v25  }
  0xa5   : > { %542 = vperm.xlu1 %1383, %v439_v27   ;;  %576 = vperm.xlu0 %1382, %v553_v26  }
  0xa9   : > { %581 = vperm.xlu1 %1383, %v554_v28   ;;  %586 = vperm.xlu0 %1382, %v555_v29  }
  0xad   : > { %591 = vperm.xlu1 %1383, %v556_v30   ;;  %625 = vperm.xlu0 %1382, %v602_v31  }
  0xb1   : > { %630 = vperm.xlu1 %1383, %v603_v32   ;;  %635 = vperm.xlu0 %1382, %v604_v33  }
  0xb5   : > { %640 = vperm.xlu1 %1383, %v605_v34   ;;  %674 = vperm.xlu0 %1382, %v651_v35  }
  0xb9   : > { %679 = vperm.xlu1 %1383, %v652_v36   ;;  %684 = vperm.xlu0 %1382, %v653_v37  }
  0xbd   : > { %689 = vperm.xlu1 %1383, %v654_v38   ;;  %723 = vperm.xlu0 %1382, %v700_v39  }
  0xc1   : > { %728 = vperm.xlu1 %1383, %v701_v40   ;;  %733 = vperm.xlu0 %1382, %v702_v41  }
  0xc5   : > { %738 = vperm.xlu1 %1383, %v703_v42   ;;  %772 = vperm.xlu0 %1382, %v749_v43  }
 0x107   : > { %v482_v44 = vpop.permute.xlu0 %481 }
 0x108   : > { %v483_v45 = vsel %vm480_vm1, %v482_v44, %v1578_v13 }
 0x109   : > { %493 = vrot.lane.b32.xlu0 %v483_v45, %s1499_s8 }
 0x10b   : > { %v485_v46 = vpop.permute.xlu1 %484  ;;  %v488_v47 = vpop.permute.xlu0 %487 }
 0x10c   : > { %v486_v48 = vsel %vm480_vm1, %v485_v46, %v1586_v19  ;;  %v489_v49 = vsel %vm480_vm1, %v488_v47, %v1580_v15 }
 0x10d   : > { %495 = vrot.lane.b32.xlu1 %v486_v48, %s1499_s8  ;;  %497 = vrot.lane.b32.xlu0 %v489_v49, %s1499_s8 }
 0x10f   : > { %v491_v51 = vpop.permute.xlu1 %490 }
 0x110   : > { %v492_v52 = vsel %vm480_vm1, %v491_v51, %v1597_v23 }
 0x111   : > { %499 = vrot.lane.b32.xlu1 %v492_v52, %s1499_s8  ;;  %782 = vperm.xlu0 %1382, %v751_v50  }
 0x115   : > { %777 = vperm.xlu1 %1383, %v750_v53   ;;  %821 = vperm.xlu0 %1382, %v798_v54  }
 0x119   : > { %787 = vperm.xlu1 %1383, %v752_v55   ;;  %831 = vperm.xlu0 %1382, %v800_v56  }
 0x11c   : > { %v1632_v59 = vpop.permute.xlu0 %527 }
 0x11d   : > { %826 = vperm.xlu1 %1383, %v799_v57  }
 0x120   : > { %v1634_v60 = vpop.permute.xlu0 %537  ;;  %v1636_v61 = vpop.permute.xlu1 %532 }
 0x121   : > { %836 = vperm.xlu1 %1383, %v801_v58  }
 0x124   : > { %v1638_v62 = vpop.permute.xlu0 %576  ;;  %v1640_v63 = vpop.permute.xlu1 %542 }
 0x128   : > { %v1642_v0 = vpop.permute.xlu0 %586  ;;  %v1644_v1 = vpop.permute.xlu1 %581 }
 0x12c   : > { %v1646_v2 = vpop.permute.xlu0 %625  ;;  %v1648_v3 = vpop.permute.xlu1 %591 }
 0x130   : > { %v1650_v4 = vpop.permute.xlu0 %635  ;;  %v1652_v5 = vpop.permute.xlu1 %630 }
 0x134   : > { %v1654_v7 = vpop.permute.xlu0 %674  ;;  %v1656_v8 = vpop.permute.xlu1 %640 }
 0x138   : > { %v1658_v9 = vpop.permute.xlu0 %684  ;;  %v1660_v10 = vpop.permute.xlu1 %679 }
 0x13c   : > { %v1662_v11 = vpop.permute.xlu0 %723  ;;  %v1664_v12 = vpop.permute.xlu1 %689 }
 0x140   : > { %v1666_v14 = vpop.permute.xlu0 %733  ;;  %v1668_v16 = vpop.permute.xlu1 %728 }
 0x144   : > { %v1670_v17 = vpop.permute.xlu0 %772  ;;  %v1672_v18 = vpop.permute.xlu1 %738 }
 0x17b   : > { %v494_v20 = vpop.permute.xlu0 %493 }
 0x17c   : > { %v501_v21 = vsel %vm480_vm1, %v494_v20, %v1578_v13 }
 0x17d   : > { %509 = vrot.lane.b32.xlu0 %v501_v21, %s1500_s17 }
 0x17f   : > { %v496_v22 = vpop.permute.xlu1 %495  ;;  %v498_v24 = vpop.permute.xlu0 %497 }
 0x180   : > { %v502_v25 = vsel %vm480_vm1, %v496_v22, %v1586_v19  ;;  %v503_v26 = vsel %vm480_vm1, %v498_v24, %v1580_v15 }
 0x181   : > { %511 = vrot.lane.b32.xlu1 %v502_v25, %s1500_s17  ;;  %513 = vrot.lane.b32.xlu0 %v503_v26, %s1500_s17 }
 0x183   : > { %v500_v27 = vpop.permute.xlu1 %499 }
 0x184   : > { %v504_v28 = vsel %vm480_vm1, %v500_v27, %v1597_v23 }
 0x185   : > { %515 = vrot.lane.b32.xlu1 %v504_v28, %s1500_s17  ;;  %558 = vrot.lane.b32.xlu0 %v501_v21, %s1501_s18 }
 0x189   : > { %560 = vrot.lane.b32.xlu1 %v502_v25, %s1501_s18  ;;  %562 = vrot.lane.b32.xlu0 %v503_v26, %s1501_s18 }
 0x18d   : > { %564 = vrot.lane.b32.xlu1 %v504_v28, %s1501_s18  ;;  %607 = vrot.lane.b32.xlu0 %v501_v21, %s1502_s19 }
 0x190   : > { %v1712_v30 = vpop.permute.xlu0 %782 }
 0x191   : > { %609 = vrot.lane.b32.xlu1 %v502_v25, %s1502_s19  ;;  %611 = vrot.lane.b32.xlu0 %v503_v26, %s1502_s19 }
 0x194   : > { %v1710_v29 = vpop.permute.xlu1 %777  ;;  %v1716_v32 = vpop.permute.xlu0 %821 }
 0x195   : > { %613 = vrot.lane.b32.xlu1 %v504_v28, %s1502_s19  ;;  %656 = vrot.lane.b32.xlu0 %v501_v21, %s1503_s20 }
 0x198   : > { %v1714_v31 = vpop.permute.xlu1 %787  ;;  %v1720_v34 = vpop.permute.xlu0 %831 }
 0x199   : > { %658 = vrot.lane.b32.xlu1 %v502_v25, %s1503_s20  ;;  %660 = vrot.lane.b32.xlu0 %v503_v26, %s1503_s20 }
 0x19c   : > { %v1718_v33 = vpop.permute.xlu1 %826 }
 0x19d   : > { %662 = vrot.lane.b32.xlu1 %v504_v28, %s1503_s20  ;;  %705 = vrot.lane.b32.xlu0 %v501_v21, %s1504_s21 }
 0x1a0   : > { %v1722_v35 = vpop.permute.xlu1 %836 }
 0x1a1   : > { %707 = vrot.lane.b32.xlu1 %v502_v25, %s1504_s21  ;;  %709 = vrot.lane.b32.xlu0 %v503_v26, %s1504_s21 }
 0x1a5   : > { %711 = vrot.lane.b32.xlu1 %v504_v28, %s1504_s21  ;;  %754 = vrot.lane.b32.xlu0 %v501_v21, %s1505_s26 }
 0x1a9   : > { %756 = vrot.lane.b32.xlu1 %v502_v25, %s1505_s26  ;;  %758 = vrot.lane.b32.xlu0 %v503_v26, %s1505_s26 }
 0x1ad   : > { %760 = vrot.lane.b32.xlu1 %v504_v28, %s1505_s26  ;;  %803 = vrot.lane.b32.xlu0 %v501_v21, %s1506_s27 }
 0x1b1   : > { %805 = vrot.lane.b32.xlu1 %v502_v25, %s1506_s27  ;;  %807 = vrot.lane.b32.xlu0 %v503_v26, %s1506_s27 }
 0x1b5   : > { %809 = vrot.lane.b32.xlu1 %v504_v28, %s1506_s27 }
 0x1ef   : > { %v510_v36 = vpop.permute.xlu0 %509 }
 0x1f0   : > { %v521_v51 = vsel %vm479_vm2, %v510_v36, 0.0 }
 0x1f1   : > { %v545_v57 = vmul.f32 %v1632_v59, %v521_v51 }
 0x1f3   : > { %v512_v37 = vpop.permute.xlu1 %511  ;;  %v514_v38 = vpop.permute.xlu0 %513 }
 0x1f4   : > { %v522_v52 = vsel %vm479_vm2, %v512_v37, 0.0  ;;  %v523_v53 = vsel %vm479_vm2, %v514_v38, 0.0 }
 0x1f5   : > { %v546_v58 = vmul.f32 %v1636_v61, %v522_v52  ;;  %v547_v22 = vmul.f32 %v1634_v60, %v523_v53 }
 0x1f7   : > { %v516_v39 = vpop.permute.xlu1 %515  ;;  %v559_v40 = vpop.permute.xlu0 %558  ;;  %v550_v36 = vadd.f32 %v546_v58, %v1586_v19  ;;  %v551_v37 = vadd.f32 %v547_v22, %v1580_v15 }
 0x1f8   : > { %v524_v56 = vsel %vm479_vm2, %v516_v39, 0.0  ;;  %v570_v20 = vsel %vm557_vm3, %v559_v40, 0.0 }
 0x1f9   : > { %v548_v24 = vmul.f32 %v1640_v63, %v524_v56  ;;  %v594_v61 = vmul.f32 %v1638_v62, %v570_v20  ;;  %v549_v63 = vadd.f32 %v545_v57, %v1578_v13 }
 0x1fb   : > { %v561_v41 = vpop.permute.xlu1 %560  ;;  %v563_v42 = vpop.permute.xlu0 %562 }
 0x1fc   : > { %v571_v21 = vsel %vm557_vm3, %v561_v41, 0.0  ;;  %v572_v25 = vsel %vm557_vm3, %v563_v42, 0.0  ;;  %v598_v42 = vadd.f32 %v594_v61, %v549_v63 }
 0x1fd   : > { %v595_v27 = vmul.f32 %v1644_v1, %v571_v21  ;;  %v596_v62 = vmul.f32 %v1642_v0, %v572_v25  ;;  %v552_v0 = vadd.f32 %v548_v24, %v1597_v23 }
 0x1ff   : > { %v565_v43 = vpop.permute.xlu1 %564  ;;  %v608_v44 = vpop.permute.xlu0 %607 }
 0x200   : > { %v573_v28 = vsel %vm557_vm3, %v565_v43, 0.0  ;;  %v619_v60 = vsel %vm606_vm4, %v608_v44, 0.0  ;;  %v599_v43 = vadd.f32 %v595_v27, %v550_v36 }
 0x201   : > { %v597_v39 = vmul.f32 %v1648_v3, %v573_v28  ;;  %v643_v13 = vmul.f32 %v1646_v2, %v619_v60 }
 0x203   : > { %v610_v45 = vpop.permute.xlu1 %609  ;;  %v612_v46 = vpop.permute.xlu0 %611  ;;  %v601_v52 = vadd.f32 %v597_v39, %v552_v0  ;;  %v647_v53 = vadd.f32 %v643_v13, %v598_v42 }
 0x204   : > { %v620_v1 = vsel %vm606_vm4, %v610_v45, 0.0  ;;  %v621_v19 = vsel %vm606_vm4, %v612_v46, 0.0 }
 0x205   : > { %v644_v45 = vmul.f32 %v1652_v5, %v620_v1 }
 0x207   : > { %v614_v47 = vpop.permute.xlu1 %613  ;;  %v657_v48 = vpop.permute.xlu0 %656  ;;  %v648_v57 = vadd.f32 %v644_v45, %v599_v43  ;;  %v445_v43 = vld [vmem:[%s1805_s30 + $0x8] sm:$0xff] }
 0x208   : > { %v668_v38 = vsel %vm655_vm5, %v657_v48, 0.0  ;;  %v622_v40 = vsel %vm606_vm4, %v614_v47, 0.0  ;;  %v600_v47 = vadd.f32 %v596_v62, %v551_v37  ;;  %v645_v48 = vmul.f32 %v1650_v4, %v621_v19 }
 0x209   : > { %v692_v3 = vmul.f32 %v1654_v7, %v668_v38  ;;  %v646_v23 = vmul.f32 %v1656_v8, %v622_v40 }
 0x20a   : > { %v649_v21 = vadd.f32 %v645_v48, %v600_v47 }
 0x20b   : > { %v659_v49 = vpop.permute.xlu1 %658  ;;  %v661_v50 = vpop.permute.xlu0 %660  ;;  %v696_v58 = vadd.f32 %v692_v3, %v647_v53  ;;  %v650_v22 = vadd.f32 %v646_v23, %v601_v52 }
 0x20c   : > { %v669_v2 = vsel %vm655_vm5, %v659_v49, 0.0  ;;  %v670_v46 = vsel %vm655_vm5, %v661_v50, 0.0 }
 0x20d   : > { %v693_v56 = vmul.f32 %v1660_v10, %v669_v2  ;;  %v694_v50 = vmul.f32 %v1658_v9, %v670_v46 }
 0x20f   : > { %v663_v54 = vpop.permute.xlu1 %662  ;;  %v706_v55 = vpop.permute.xlu0 %705  ;;  %v698_v61 = vadd.f32 %v694_v50, %v649_v21 }
 0x210   : > { %v717_v44 = vsel %vm704_vm6, %v706_v55, 0.0  ;;  %v671_v4 = vsel %vm655_vm5, %v663_v54, 0.0 }
 0x211   : > { %v741_v5 = vmul.f32 %v1662_v11, %v717_v44  ;;  %v695_v24 = vmul.f32 %v1664_v12, %v671_v4 }
 0x213   : > { %v708_v59 = vpop.permute.xlu1 %707  ;;  %v710_v26 = vpop.permute.xlu0 %709  ;;  %v745_v54 = vadd.f32 %v741_v5, %v696_v58  ;;  %v699_v62 = vadd.f32 %v695_v24, %v650_v22 }
 0x214   : > { %v718_v7 = vsel %vm704_vm6, %v708_v59, 0.0  ;;  %v719_v8 = vsel %vm704_vm6, %v710_v26, 0.0  ;;  %v697_v26 = vadd.f32 %v693_v56, %v648_v57 }
 0x215   : > { %v742_v10 = vmul.f32 %v1668_v16, %v718_v7  ;;  %v743_v25 = vmul.f32 %v1666_v14, %v719_v8 }
 0x217   : > { %v712_v41 = vpop.permute.xlu1 %711  ;;  %v755_v15 = vpop.permute.xlu0 %754  ;;  %v746_v36 = vadd.f32 %v742_v10, %v697_v26 }
 0x218   : > { %v766_v51 = vsel %vm753_vm7, %v755_v15, 0.0  ;;  %v720_v59 = vsel %vm704_vm6, %v712_v41, 0.0 }
 0x219   : > { %v790_v11 = vmul.f32 %v1670_v17, %v766_v51  ;;  %v744_v37 = vmul.f32 %v1672_v18, %v720_v59  ;;  %v1507_v51 = vmov 0.0  }
 0x21b   : > { %v757_v55 = vpop.permute.xlu1 %756  ;;  %v759_v49 = vpop.permute.xlu0 %758  ;;  %v794_v28 = vadd.f32 %v790_v11, %v745_v54  ;;  %v748_v42 = vadd.f32 %v744_v37, %v699_v62 }
 0x21c   : > { %v767_v20 = vsel %vm753_vm7, %v757_v55, 0.0  ;;  %v768_v9 = vsel %vm753_vm7, %v759_v49, 0.0 }
 0x21d   : > { %v791_v27 = vmul.f32 %v1710_v29, %v767_v20  ;;  %v792_v14 = vmul.f32 %v1712_v30, %v768_v9  ;;  %v444_v29 = vld [vmem:[%s1805_s30] sm:$0xff]  ;;  %v747_v30 = vadd.f32 %v743_v25, %v698_v61 }
 0x21f   : > { %v761_v17 = vpop.permute.xlu1 %760  ;;  %v804_v16 = vpop.permute.xlu0 %803  ;;  %v795_v13 = vadd.f32 %v791_v27, %v746_v36  ;;  %v796_v40 = vadd.f32 %v792_v14, %v747_v30 }
 0x220   : > { %v815_v12 = vsel %vm802_vm8, %v804_v16, 0.0  ;;  %v769_v60 = vsel %vm753_vm7, %v761_v17, 0.0 }
 0x221   : > { %v839_v63 = vmul.f32 %v1716_v32, %v815_v12  ;;  %v793_v32 = vmul.f32 %v1714_v31, %v769_v60  ;;  %v446_v31 = vld [vmem:[%s1805_s30 + $0x10] sm:$0xff] }
 0x223   : > { %v843_v1 = vadd.f32 %v839_v63, %v794_v28  ;;  %v806_v38 = vpop.permute.xlu1 %805  ;;  %v808_v39 = vpop.permute.xlu0 %807  ;;  %v797_v2 = vadd.f32 %v793_v32, %v748_v42 }
 0x224   : > { %v816_v18 = vsel %vm802_vm8, %v806_v38, 0.0  ;;  %v817_v19 = vsel %vm802_vm8, %v808_v39, 0.0 }
 0x225   : > { %v847_v41 = vsub.f32 %v843_v1, %v444_v29  ;;  %1076 = vst.msk [vmem:[%s1819_s10] sm:$0xff] %vm1067_vm9, %v843_v1  ;;  %v840_v15 = vmul.f32 %v1718_v33, %v816_v18  ;;  %v841_v0 = vmul.f32 %v1720_v34, %v817_v19  ;;  %v447_v34 = vld [vmem:[%s1805_s30 + $0x18] sm:$0xff] }
 0x227   : > { %v844_v44 = vadd.f32 %v840_v15, %v795_v13  ;;  %v845_v45 = vadd.f32 %v841_v0, %v796_v40  ;;  %v810_v3 = vpop.permute.xlu1 %809  ;;  %vm851_vm10 = vcmp.gt.f32.partialorder %v847_v41, 0.0 }
 0x228   : > { %v818_v46 = vsel %vm802_vm8, %v810_v3, 0.0  ;;  %v1842_v52 = vsel %vm851_vm10, 1.0, %v1507_v51 }
 0x229   : > { %v848_v47 = vsub.f32 %v844_v44, %v445_v43  ;;  %1077 = vst.msk [vmem:[%s1819_s10 + $0x8] sm:$0xff] %vm1067_vm9, %v844_v44  ;;  %v849_v48 = vsub.f32 %v845_v45, %v446_v31  ;;  %1078 = vst.msk [vmem:[%s1819_s10 + $0x10] sm:$0xff] %vm1067_vm9, %v845_v45  ;;  %v842_v33 = vmul.f32 %v1722_v35, %v818_v46 }
 0x22b   : > { %vm852_vm11 = vcmp.gt.f32.partialorder %v848_v47, 0.0  ;;  %v846_v23 = vadd.f32 %v842_v33, %v797_v2  ;;  %vm853_vm12 = vcmp.gt.f32.partialorder %v849_v48, 0.0 }
 0x22c   : > { %v1845_v53 = vsel %vm852_vm11, 1.0, %v1507_v51  ;;  %v1853_v35 = vsel %vm853_vm12, 1.0, %v1507_v51 }
 0x22d   : > { %v850_v5 = vsub.f32 %v846_v23, %v447_v34  ;;  %1079 = vst.msk [vmem:[%s1819_s10 + $0x18] sm:$0xff] %vm1067_vm9, %v846_v23  ;;  %v1384_v7 = vpack.i.bf16 %v1845_v53, %v1842_v52 }
 0x22f   : > { %vm854_vm13 = vcmp.gt.f32.partialorder %v850_v5, 0.0  ;;  %1385 = vrot.lane.b32.xlu0 %v1384_v7, %s1499_s8 }
 0x230   : > { %v1856_v55 = vsel %vm854_vm13, 1.0, %v1507_v51 }
 0x231   : > { %v1389_v49 = vpack.i.bf16 %v1856_v55, %v1853_v35 }
 0x233   : > { %1390 = vrot.lane.b32.xlu1 %v1389_v49, %s1499_s8 }
 0x2a1   : > { %v1386_v56 = vpop.permute.xlu0 %1385 }
 0x2a2   : > { %v1388_v50 = vunpack.i.h.bf16 %v1386_v56  ;;  %v1387_v4 = vunpack.i.l.bf16 %v1386_v56 }
 0x2a4   : > { %v865_v8 = vsel %vm480_vm1, %v1387_v4, %v1842_v52  ;;  %v868_v57 = vsel %vm480_vm1, %v1388_v50, %v1845_v53 }
 0x2a5   : > { %v1391_v58 = vpop.permute.xlu1 %1390  ;;  %v1394_v11 = vpack.i.bf16 %v868_v57, %v865_v8 }
 0x2a6   : > { %v1393_v20 = vunpack.i.h.bf16 %v1391_v58  ;;  %v1392_v21 = vunpack.i.l.bf16 %v1391_v58 }
 0x2a7   : > { %1395 = vrot.lane.b32.xlu0 %v1394_v11, %s1499_s8 }
 0x2a8   : > { %v871_v22 = vsel %vm480_vm1, %v1392_v21, %v1853_v35  ;;  %v874_v10 = vsel %vm480_vm1, %v1393_v20, %v1856_v55 }
 0x2a9   : > { %v1399_v9 = vpack.i.bf16 %v874_v10, %v871_v22 }
 0x2ab   : > { %1400 = vrot.lane.b32.xlu1 %v1399_v9, %s1499_s8 }
 0x319   : > { %v1396_v24 = vpop.permute.xlu0 %1395 }
 0x31a   : > { %v1398_v54 = vunpack.i.h.bf16 %v1396_v24  ;;  %v1397_v25 = vunpack.i.l.bf16 %v1396_v24 }
 0x31c   : > { %v884_v59 = vsel %vm480_vm1, %v1398_v54, %v1845_v53  ;;  %v883_v17 = vsel %vm480_vm1, %v1397_v25, %v1842_v52 }
 0x31d   : > { %v1401_v16 = vpop.permute.xlu1 %1400  ;;  %v1404_v26 = vpack.i.bf16 %v884_v59, %v883_v17 }
 0x31e   : > { %v1403_v61 = vunpack.i.h.bf16 %v1401_v16  ;;  %v1402_v27 = vunpack.i.l.bf16 %v1401_v16 }
 0x31f   : > { %1405 = vrot.lane.b32.xlu0 %v1404_v26, %s1500_s17 }
 0x320   : > { %v886_v12 = vsel %vm480_vm1, %v1403_v61, %v1856_v55  ;;  %v885_v28 = vsel %vm480_vm1, %v1402_v27, %v1853_v35 }
 0x321   : > { %v1409_v14 = vpack.i.bf16 %v886_v12, %v885_v28 }
 0x323   : > { %1410 = vrot.lane.b32.xlu1 %v1409_v14, %s1500_s17  ;;  %1415 = vrot.lane.b32.xlu0 %v1404_v26, %s1501_s18 }
 0x327   : > { %1420 = vrot.lane.b32.xlu1 %v1409_v14, %s1501_s18  ;;  %1425 = vrot.lane.b32.xlu0 %v1404_v26, %s1502_s19 }
 0x32b   : > { %1430 = vrot.lane.b32.xlu1 %v1409_v14, %s1502_s19  ;;  %1435 = vrot.lane.b32.xlu0 %v1404_v26, %s1503_s20 }
 0x32f   : > { %1440 = vrot.lane.b32.xlu1 %v1409_v14, %s1503_s20  ;;  %1445 = vrot.lane.b32.xlu0 %v1404_v26, %s1504_s21 }
 0x333   : > { %1450 = vrot.lane.b32.xlu1 %v1409_v14, %s1504_s21  ;;  %1455 = vrot.lane.b32.xlu0 %v1404_v26, %s1505_s26 }
 0x337   : > { %1460 = vrot.lane.b32.xlu1 %v1409_v14, %s1505_s26  ;;  %1465 = vrot.lane.b32.xlu0 %v1404_v26, %s1506_s27 }
 0x33b   : > { %1470 = vrot.lane.b32.xlu1 %v1409_v14, %s1506_s27 }
 0x391   : > { %v1406_v60 = vpop.permute.xlu0 %1405 }
 0x392   : > { %v1408_v63 = vunpack.i.h.bf16 %v1406_v60  ;;  %v1407_v36 = vunpack.i.l.bf16 %v1406_v60 }
 0x394   : > { %v904_v37 = vsel %vm479_vm2, %v1408_v63, 0.0  ;;  %v903_v29 = vsel %vm479_vm2, %v1407_v36, 0.0 }
 0x395   : > { %v1411_v62 = vpop.permute.xlu1 %1410  ;;  %v1416_v30 = vpop.permute.xlu0 %1415  ;;  %v908_v32 = vmul.f32 2.0, %v904_v37  ;;  %v907_v18 = vmul.f32 2.0, %v903_v29 }
 0x396   : > { %v1413_v1 = vunpack.i.h.bf16 %v1411_v62  ;;  %v1412_v38 = vunpack.i.l.bf16 %v1411_v62  ;;  %v1418_v39 = vunpack.i.h.bf16 %v1416_v30  ;;  %v1417_v13 = vunpack.i.l.bf16 %v1416_v30 }
 0x397   : > { %v912_v48 = vadd.f32 %v1845_v53, %v908_v32  ;;  %v911_v33 = vadd.f32 %v1842_v52, %v907_v18 }
 0x398   : > { %v906_v19 = vsel %vm479_vm2, %v1413_v1, 0.0  ;;  %v905_v40 = vsel %vm479_vm2, %v1412_v38, 0.0  ;;  %v928_v41 = vsel %vm557_vm3, %v1418_v39, 0.0  ;;  %v927_v15 = vsel %vm557_vm3, %v1417_v13, 0.0 }
 0x399   : > { %v910_v0 = vmul.f32 2.0, %v906_v19  ;;  %v909_v42 = vmul.f32 2.0, %v905_v40  ;;  %v932_v43 = vmul.f32 3.0, %v928_v41  ;;  %v931_v31 = vmul.f32 3.0, %v927_v15  ;;  %v1421_v44 = vpop.permute.xlu1 %1420  ;;  %v1426_v45 = vpop.permute.xlu0 %1425 }
 0x39a   : > { %v1423_v3 = vunpack.i.h.bf16 %v1421_v44  ;;  %v1422_v2 = vunpack.i.l.bf16 %v1421_v44  ;;  %v1428_v46 = vunpack.i.h.bf16 %v1426_v45  ;;  %v1427_v47 = vunpack.i.l.bf16 %v1426_v45 }
 0x39b   : > { %v914_v34 = vadd.f32 %v1856_v55, %v910_v0  ;;  %v913_v23 = vadd.f32 %v1853_v35, %v909_v42  ;;  %v935_v50 = vadd.f32 %v931_v31, %v911_v33  ;;  %v936_v53 = vadd.f32 %v932_v43, %v912_v48 }
 0x39c   : > { %v930_v5 = vsel %vm557_vm3, %v1423_v3, 0.0  ;;  %v929_v7 = vsel %vm557_vm3, %v1422_v2, 0.0  ;;  %v952_v49 = vsel %vm606_vm4, %v1428_v46, 0.0  ;;  %v951_v56 = vsel %vm606_vm4, %v1427_v47, 0.0 }
 0x39d   : > { %v934_v4 = vmul.f32 3.0, %v930_v5  ;;  %v933_v52 = vmul.f32 3.0, %v929_v7  ;;  %v1431_v8 = vpop.permute.xlu1 %1430  ;;  %v1436_v55 = vpop.permute.xlu0 %1435  ;;  %v956_v22 = vmul.f32 4.0, %v952_v49  ;;  %v955_v10 = vmul.f32 4.0, %v951_v56 }
 0x39e   : > { %v1433_v57 = vunpack.i.h.bf16 %v1431_v8  ;;  %v1432_v35 = vunpack.i.l.bf16 %v1431_v8  ;;  %v1438_v58 = vunpack.i.h.bf16 %v1436_v55  ;;  %v1437_v11 = vunpack.i.l.bf16 %v1436_v55 }
 0x39f   : > { %v937_v20 = vadd.f32 %v933_v52, %v913_v23  ;;  %v938_v21 = vadd.f32 %v934_v4, %v914_v34  ;;  %v959_v63 = vadd.f32 %v955_v10, %v935_v50  ;;  %v960_v36 = vadd.f32 %v956_v22, %v936_v53 }
 0x3a0   : > { %v954_v9 = vsel %vm606_vm4, %v1433_v57, 0.0  ;;  %v953_v24 = vsel %vm606_vm4, %v1432_v35, 0.0  ;;  %v976_v54 = vsel %vm655_vm5, %v1438_v58, 0.0  ;;  %v975_v25 = vsel %vm655_vm5, %v1437_v11, 0.0 }
 0x3a1   : > { %v958_v59 = vmul.f32 4.0, %v954_v9  ;;  %v957_v17 = vmul.f32 4.0, %v953_v24  ;;  %v980_v16 = vmul.f32 5.0, %v976_v54  ;;  %v979_v26 = vmul.f32 5.0, %v975_v25  ;;  %v1441_v61 = vpop.permute.xlu1 %1440  ;;  %v1446_v27 = vpop.permute.xlu0 %1445 }
 0x3a2   : > { %v1443_v12 = vunpack.i.h.bf16 %v1441_v61  ;;  %v1442_v28 = vunpack.i.l.bf16 %v1441_v61  ;;  %v1448_v14 = vunpack.i.h.bf16 %v1446_v27  ;;  %v1447_v60 = vunpack.i.l.bf16 %v1446_v27 }
 0x3a3   : > { %v961_v37 = vadd.f32 %v957_v17, %v937_v20  ;;  %v962_v29 = vadd.f32 %v958_v59, %v938_v21  ;;  %v983_v39 = vadd.f32 %v979_v26, %v959_v63  ;;  %v984_v13 = vadd.f32 %v980_v16, %v960_v36 }
 0x3a4   : > { %v978_v62 = vsel %vm655_vm5, %v1443_v12, 0.0  ;;  %v977_v30 = vsel %vm655_vm5, %v1442_v28, 0.0  ;;  %v1000_v1 = vsel %vm704_vm6, %v1448_v14, 0.0  ;;  %v999_v38 = vsel %vm704_vm6, %v1447_v60, 0.0 }
 0x3a5   : > { %v1004_v32 = vmul.f32 6.0, %v1000_v1  ;;  %v1003_v18 = vmul.f32 6.0, %v999_v38  ;;  %v1451_v19 = vpop.permute.xlu1 %1450  ;;  %v1456_v40 = vpop.permute.xlu0 %1455  ;;  %v982_v43 = vmul.f32 5.0, %v978_v62  ;;  %v981_v31 = vmul.f32 5.0, %v977_v30 }
 0x3a6   : > { %v1453_v41 = vunpack.i.h.bf16 %v1451_v19  ;;  %v1452_v15 = vunpack.i.l.bf16 %v1451_v19  ;;  %v1458_v0 = vunpack.i.h.bf16 %v1456_v40  ;;  %v1457_v42 = vunpack.i.l.bf16 %v1456_v40 }
 0x3a7   : > { %v1007_v44 = vadd.f32 %v1003_v18, %v983_v39  ;;  %v1008_v45 = vadd.f32 %v1004_v32, %v984_v13  ;;  %v985_v4 = vadd.f32 %v981_v31, %v961_v37  ;;  %v986_v52 = vadd.f32 %v982_v43, %v962_v29 }
 0x3a8   : > { %v1002_v3 = vsel %vm704_vm6, %v1453_v41, 0.0  ;;  %v1001_v2 = vsel %vm704_vm6, %v1452_v15, 0.0  ;;  %v1024_v46 = vsel %vm753_vm7, %v1458_v0, 0.0  ;;  %v1023_v47 = vsel %vm753_vm7, %v1457_v42, 0.0 }
 0x3a9   : > { %v1006_v48 = vmul.f32 6.0, %v1002_v3  ;;  %v1005_v33 = vmul.f32 6.0, %v1001_v2  ;;  %v1028_v34 = vmul.f32 7.0, %v1024_v46  ;;  %v1027_v23 = vmul.f32 7.0, %v1023_v47  ;;  %v1461_v5 = vpop.permute.xlu1 %1460  ;;  %v1466_v7 = vpop.permute.xlu0 %1465 }
 0x3aa   : > { %v1463_v49 = vunpack.i.h.bf16 %v1461_v5  ;;  %v1462_v56 = vunpack.i.l.bf16 %v1461_v5  ;;  %v1468_v50 = vunpack.i.h.bf16 %v1466_v7  ;;  %v1467_v53 = vunpack.i.l.bf16 %v1466_v7 }
 0x3ab   : > { %v1031_v8 = vadd.f32 %v1027_v23, %v1007_v44  ;;  %v1032_v55 = vadd.f32 %v1028_v34, %v1008_v45  ;;  %v1009_v24 = vadd.f32 %v1005_v33, %v985_v4  ;;  %v1010_v54 = vadd.f32 %v1006_v48, %v986_v52 }
 0x3ac   : > { %v1026_v57 = vsel %vm753_vm7, %v1463_v49, 0.0  ;;  %v1025_v35 = vsel %vm753_vm7, %v1462_v56, 0.0  ;;  %v1048_v58 = vsel %vm802_vm8, %v1468_v50, 0.0  ;;  %v1047_v11 = vsel %vm802_vm8, %v1467_v53, 0.0 }
 0x3ad   : > { %v1030_v20 = vmul.f32 7.0, %v1026_v57  ;;  %v1029_v21 = vmul.f32 7.0, %v1025_v35  ;;  %v1052_v22 = vmul.f32 8.0, %v1048_v58  ;;  %v1051_v10 = vmul.f32 8.0, %v1047_v11  ;;  %v1471_v9 = vpop.permute.xlu1 %1470 }
 0x3ae   : > { %v1473_v25 = vunpack.i.h.bf16 %v1471_v9  ;;  %v1472_v59 = vunpack.i.l.bf16 %v1471_v9 }
 0x3af   : > { %v1055_v17 = vadd.f32 %v1051_v10, %v1031_v8  ;;  %v1056_v16 = vadd.f32 %v1052_v22, %v1032_v55  ;;  %v1033_v26 = vadd.f32 %v1029_v21, %v1009_v24  ;;  %v1034_v61 = vadd.f32 %v1030_v20, %v1010_v54 }
 0x3b0   : > { %v1050_v27 = vsel %vm802_vm8, %v1473_v25, 0.0  ;;  %v1049_v12 = vsel %vm802_vm8, %v1472_v59, 0.0 }
 0x3b1   : > { %vm1059_vm14 = vcmp.eq.f32.partialorder %v1055_v17, 1.0  ;;  %vm1060_vm15 = vcmp.eq.f32.partialorder %v1056_v16, 1.0  ;;  %1072 = vst.msk [vmem:[%s420_s12] sm:$0xff] %vm1067_vm9, %v1055_v17  ;;  %1073 = vst.msk [vmem:[%s420_s12 + $0x8] sm:$0xff] %vm1067_vm9, %v1056_v16  ;;  %v1054_v28 = vmul.f32 8.0, %v1050_v27  ;;  %v1053_v14 = vmul.f32 8.0, %v1049_v12 }
 0x3b2   : > { %v1063_v60 = vsel %vm1059_vm14, 1.0, %v1507_v51  ;;  %v1064_v63 = vsel %vm1060_vm15, 1.0, %v1507_v51 }
 0x3b3   : > { %1068 = vst.msk [vmem:[%s410_s15] sm:$0xff] %vm1067_vm9, %v1063_v60  ;;  %1069 = vst.msk [vmem:[%s410_s15 + $0x8] sm:$0xff] %vm1067_vm9, %v1064_v63  ;;  %v1057_v36 = vadd.f32 %v1053_v14, %v1033_v26  ;;  %v1058_v37 = vadd.f32 %v1054_v28, %v1034_v61 }
 0x3b5   : > { %vm1061_vm0 = vcmp.eq.f32.partialorder %v1057_v36, 1.0  ;;  %vm1062_vm1 = vcmp.eq.f32.partialorder %v1058_v37, 1.0  ;;  %1074 = vst.msk [vmem:[%s420_s12 + $0x10] sm:$0xff] %vm1067_vm9, %v1057_v36  ;;  %1075 = vst.msk [vmem:[%s420_s12 + $0x18] sm:$0xff] %vm1067_vm9, %v1058_v37 }
 0x3b6   : > { %v1065_v6 = vsel %vm1061_vm0, 1.0, %v1507_v51  ;;  %v1066_v29 = vsel %vm1062_vm1, 1.0, %v1507_v51 }
 0x3b7   : > { %1070 = vst.msk [vmem:[%s410_s15 + $0x10] sm:$0xff] %vm1067_vm9, %v1065_v6  ;;  %1071 = vst.msk [vmem:[%s410_s15 + $0x18] sm:$0xff] %vm1067_vm9, %v1066_v29 }
 0x3b8 PF: > { %s17_s23 = sadd.s32 1, %s1496_s23   ;;  %s1989_s21 = smov %s1492_s22 }
 0x3b9   : > { %p14_p5 = scmp.ge.s32.totalorder %s17_s23, 4   ;;  %s1990_s22 = smov %s1992_s24 }
 0x3bb   :  { %16 = sbr.rel (!%p14_p5) target bundleno = 2 (0x2), region = 99 }

</bundles_post_ra>
